<compile_context>
chip_gen: v7x
topology: tpu7x:2x2x1
jax: 0.10.0
libtpu: 0.0.40
codegen_flags: <defaults>
</compile_context>

<pallas_src>
import functools

import jax
import jax.numpy as jnp
from jax.experimental import pallas as pl
from jax.experimental.pallas import tpu as pltpu


def _round_up(n, m):
    return (n + m - 1) // m * m


# ---------------------------------------------------------------------------
# Kernel 1: hidden layer  h = relu(BN(x @ W1x + one_hot(cat) @ W1c + b1)).
# Runs once (no grid): every operand is tiny (b x n_input, n_hidden = 128).
# ---------------------------------------------------------------------------
def _hidden_kernel(*refs, has_cat):
    if has_cat:
        (x_ref, cat_ref, w1x_ref, w1c_ref,
         b1_ref, gamma_ref, beta_ref, h_ref) = refs
    else:
        x_ref, w1x_ref, b1_ref, gamma_ref, beta_ref, h_ref = refs

    b = x_ref.shape[0]
    h = jnp.dot(x_ref[...], w1x_ref[...], preferred_element_type=jnp.float32)
    if has_cat:
        n_cat = w1c_ref.shape[0]
        one_hot = (cat_ref[...] ==
                   jax.lax.broadcasted_iota(jnp.int32, (b, n_cat), 1)
                   ).astype(w1c_ref.dtype)
        h = h + jnp.dot(one_hot, w1c_ref[...],
                        preferred_element_type=jnp.float32)
    h = h + b1_ref[...]

    # BatchNorm1d, training statistics: biased variance, eps = 1e-3.
    # Two-pass centered variance avoids E[h^2] - mean^2 cancellation.
    mean = jnp.mean(h, axis=0, keepdims=True)
    centered = h - mean
    var = jnp.mean(centered * centered, axis=0, keepdims=True)
    hn = centered * (gamma_ref[...] * jax.lax.rsqrt(var + 1e-3)) + beta_ref[...]
    h_ref[...] = jnp.maximum(hn, 0.0).astype(h_ref.dtype)


# ---------------------------------------------------------------------------
# Kernel 2: fused mean/var heads.  One grid step per output tile; tile j's
# weights are the fully contiguous (n_hidden, 2*tn) slab [Wm_j | Wv_j].
# The mean half is stored before the var half is computed so only tn f32
# columns are ever live (keeps vreg pressure low at large tn).
# ---------------------------------------------------------------------------
def _heads_kernel(h_ref, wh_ref, bh_ref, pm_ref, pv_ref):
    tn = pm_ref.shape[1]
    h = h_ref[...]
    pm = jnp.dot(h, wh_ref[:, :tn], preferred_element_type=jnp.float32)
    pm_ref[...] = (pm + bh_ref[:, :tn]).astype(pm_ref.dtype)
    pv = jnp.dot(h, wh_ref[:, tn:], preferred_element_type=jnp.float32)
    pv_ref[...] = jnp.exp(pv + bh_ref[:, tn:]).astype(pv_ref.dtype)


# ---------------------------------------------------------------------------
# Parameter construction / packing (all outside jit).
# ---------------------------------------------------------------------------
def init_decoder_params(key, n_input, n_output, n_cat, n_hidden):
    """Deterministic synthetic parameters (PyTorch-style uniform fan-in init)."""
    ks = jax.random.split(key, 8)

    def linear(kw, kb, fan_in, fan_out):
        bound = 1.0 / jnp.sqrt(jnp.float32(fan_in))
        w = jax.random.uniform(kw, (fan_in, fan_out), jnp.float32, -bound, bound)
        b = jax.random.uniform(kb, (1, fan_out), jnp.float32, -bound, bound)
        return w, b

    w1, b1 = linear(ks[0], ks[1], n_input + n_cat, n_hidden)
    wm, bm = linear(ks[2], ks[3], n_hidden, n_output)
    wv, bv = linear(ks[4], ks[5], n_hidden, n_output)
    gamma = jnp.ones((1, n_hidden), jnp.float32)
    beta = jnp.zeros((1, n_hidden), jnp.float32)
    return dict(w1=w1, b1=b1, gamma=gamma, beta=beta,
                wm=wm, bm=bm, wv=wv, bv=bv,
                n_cat=int(n_cat), n_input=int(n_input))


def _choose_tn(n_out, target=2048):
    """Largest tile (<= target, >= 128) that keeps >= 4 grid steps if possible."""
    n_pad = _round_up(n_out, 128)
    quarter = (n_pad // 4) // 128 * 128
    return max(128, min(target, quarter))


def pack_decoder_params(params, tn):
    """Pad / reorder weights for the kernels.  Call ONCE, outside jit."""
    n_cat = int(params["n_cat"])
    n_in = int(params["n_input"])
    w1 = params["w1"]                                   # (n_in + n_cat, n_hidden)
    w1x = w1[:n_in].astype(jnp.bfloat16)
    w1c = w1[n_in:].astype(jnp.bfloat16)

    wm, wv = params["wm"], params["wv"]                 # (n_hidden, n_output)
    bm, bv = params["bm"], params["bv"]                 # (1, n_output)
    n_hidden, n_out = wm.shape
    n_pad = _round_up(n_out, tn)
    pad = n_pad - n_out
    wm = jnp.pad(wm, ((0, 0), (0, pad)))
    wv = jnp.pad(wv, ((0, 0), (0, pad)))
    bm = jnp.pad(bm, ((0, 0), (0, pad)))
    bv = jnp.pad(bv, ((0, 0), (0, pad)))
    nt = n_pad // tn
    # (nt, n_hidden, 2*tn): tile j = [Wm_j | Wv_j], fully contiguous in HBM.
    wh = jnp.concatenate(
        [wm.reshape(n_hidden, nt, tn), wv.reshape(n_hidden, nt, tn)],
        axis=2).transpose(1, 0, 2).astype(jnp.bfloat16)
    bh = jnp.concatenate(
        [bm.reshape(1, nt, tn), bv.reshape(1, nt, tn)],
        axis=2).reshape(1, nt * 2 * tn)
    return dict(w1x=w1x, w1c=w1c, b1=params["b1"],
                gamma=params["gamma"], beta=params["beta"],
                wh=wh, bh=bh, n_out=n_out, n_pad=n_pad, nt=nt, tn=tn,
                n_cat=n_cat)


# ---------------------------------------------------------------------------
# Forward builder: packs once, returns a jitted forward(x, cat).
# ---------------------------------------------------------------------------
def build_decoder_forward(params, tn=None, out_dtype=jnp.float32):
    n_out = params["wm"].shape[1]
    if tn is None:
        tn = _choose_tn(n_out)
    packed = pack_decoder_params(params, tn)            # cached bf16 slabs
    n_hidden = packed["w1x"].shape[1]
    n_pad, nt, n_cat = packed["n_pad"], packed["nt"], packed["n_cat"]
    has_cat = n_cat > 0

    hidden_kernel = functools.partial(_hidden_kernel, has_cat=has_cat)

    def _hidden(x_bf, cat2d):
        b = x_bf.shape[0]
        if has_cat:
            args = (x_bf, cat2d, packed["w1x"], packed["w1c"])
        else:
            args = (x_bf, packed["w1x"])
        args = args + (packed["b1"], packed["gamma"], packed["beta"])
        return pl.pallas_call(
            hidden_kernel,
            out_shape=jax.ShapeDtypeStruct((b, n_hidden), jnp.bfloat16),
        )(*args)

    def _heads(h):
        b = h.shape[0]
        return pl.pallas_call(
            _heads_kernel,
            out_shape=(jax.ShapeDtypeStruct((b, n_pad), out_dtype),
                       jax.ShapeDtypeStruct((b, n_pad), out_dtype)),
            grid=(nt,),
            in_specs=[
                pl.BlockSpec((b, n_hidden), lambda j: (0, 0)),          # h resident
                pl.BlockSpec((None, n_hidden, 2 * tn), lambda j: (j, 0, 0)),
                pl.BlockSpec((1, 2 * tn), lambda j: (0, j)),
            ],
            out_specs=(pl.BlockSpec((b, tn), lambda j: (0, j)),
                       pl.BlockSpec((b, tn), lambda j: (0, j))),
            compiler_params=pltpu.CompilerParams(
                dimension_semantics=("parallel",)),
        )(h, packed["wh"], packed["bh"])

    @jax.jit
    def forward(x, cat=None):
        b = x.shape[0]
        x_bf = x.astype(jnp.bfloat16)
        if has_cat:
            assert cat is not None, "categorical covariate required (n_cat > 0)"
            cat2d = cat.astype(jnp.int32).reshape(b, 1)
        else:
            cat2d = None
        h = _hidden(x_bf, cat2d)
        pm, pv = _heads(h)
        return pm[:, :n_out], pv[:, :n_out]

    return forward


# ---------------------------------------------------------------------------
# Pure-JAX f32 reference (mirrors the PyTorch forward, train-mode BN).
# ---------------------------------------------------------------------------
def decoder_reference(x, cat, params):
    oh = jax.nn.one_hot(cat, params["n_cat"], dtype=x.dtype)
    xc = jnp.concatenate([x, oh], axis=-1)
    h = xc @ params["w1"] + params["b1"]
    mean = jnp.mean(h, axis=0, keepdims=True)
    var = jnp.mean((h - mean) ** 2, axis=0, keepdims=True)
    h = (h - mean) * jax.lax.rsqrt(var + 1e-3) * params["gamma"] + params["beta"]
    h = jnp.maximum(h, 0.0)
    p_m = h @ params["wm"] + params["bm"]
    p_v = jnp.exp(h @ params["wv"] + params["bv"])
    return p_m, p_v


if __name__ == "__main__":
    # Small shapes consistent with the module (n_hidden=128 is the scvi default).
    batch, n_input, n_output, n_hidden = 8, 16, 24, 128
    n_cat_list = [3]                       # one categorical covariate, 3 levels

    key = jax.random.PRNGKey(0)
    k_x, k_cat, k_params = jax.random.split(key, 3)

    x = jax.random.normal(k_x, (batch, n_input), dtype=jnp.float32)
    cat = jax.random.randint(k_cat, (batch,), 0, n_cat_list[0])

    params = init_decoder_params(
        k_params, n_input, n_output,
        n_cat=sum(c if c > 1 else 0 for c in n_cat_list),
        n_hidden=n_hidden)

    # TODO(synk): eval-mode BatchNorm (running statistics) not implemented;
    # training-batch statistics are used, matching the reference above.
    forward = build_decoder_forward(params)
    p_m, p_v = forward(x, cat)
    jax.block_until_ready((p_m, p_v))

    assert p_m.shape == (batch, n_output) and p_v.shape == (batch, n_output)
    assert bool(jnp.all(p_v > 0.0))        # variance head is exp(.) > 0

    # Validate against the f32 reference (tolerances cover bf16 MXU operands).
    rm, rv = decoder_reference(x, cat, params)
    assert bool(jnp.allclose(p_m, rm, rtol=0.1, atol=0.1))
    assert bool(jnp.allclose(p_v, rv, rtol=0.1, atol=0.1))

    print("KERNEL_OK")
</pallas_src>

<mosaic_0001>
module attributes {stable_mosaic.version = 11 : i64} {
  func.func @_hidden_kernel(%arg0: memref<8x16xbf16, #tpu.memory_space<vmem>>, %arg1: memref<8x1xi32, #tpu.memory_space<vmem>>, %arg2: memref<16x128xbf16, #tpu.memory_space<vmem>>, %arg3: memref<3x128xbf16, #tpu.memory_space<vmem>>, %arg4: memref<1x128xf32, #tpu.memory_space<vmem>>, %arg5: memref<1x128xf32, #tpu.memory_space<vmem>>, %arg6: memref<1x128xf32, #tpu.memory_space<vmem>>, %arg7: memref<8x128xbf16, #tpu.memory_space<vmem>>) attributes {dimension_semantics = [], scalar_prefetch = 0 : i64, scratch_operands = 0 : i64, tpu.core_type = #tpu.core_type<tc>} {
    %c0 = arith.constant 0 : index
    %c0_0 = arith.constant 0 : index
    %0 = vector.load %arg0[%c0, %c0_0] : memref<8x16xbf16, #tpu.memory_space<vmem>>, vector<8x16xbf16>
    %c0_1 = arith.constant 0 : index
    %c0_2 = arith.constant 0 : index
    %1 = vector.load %arg2[%c0_1, %c0_2] : memref<16x128xbf16, #tpu.memory_space<vmem>>, vector<16x128xbf16>
    %cst = arith.constant dense<0.000000e+00> : vector<8x128xf32>
    %2 = tpu.matmul %0, %1, %cst {dimension_numbers = #tpu.dot_dimension_numbers<[1], [0], [0], [1], [0, 0, 1, 1], [], []>} : vector<8x16xbf16>, vector<16x128xbf16>, vector<8x128xf32> -> vector<8x128xf32>
    %c0_3 = arith.constant 0 : index
    %c0_4 = arith.constant 0 : index
    %3 = vector.load %arg1[%c0_3, %c0_4] : memref<8x1xi32, #tpu.memory_space<vmem>>, vector<8x1xi32>
    %4 = tpu.iota {dimensions = array<i32: 1>} : vector<8x3xi32>
    %5 = vector.broadcast %3 : vector<8x1xi32> to vector<8x3xi32>
    %6 = arith.cmpi eq, %5, %4 : vector<8x3xi32>
    %7 = arith.extui %6 : vector<8x3xi1> to vector<8x3xi32>
    %8 = arith.sitofp %7 : vector<8x3xi32> to vector<8x3xf32>
    %9 = arith.truncf %8 : vector<8x3xf32> to vector<8x3xbf16>
    %c0_5 = arith.constant 0 : index
    %c0_6 = arith.constant 0 : index
    %10 = vector.load %arg3[%c0_5, %c0_6] : memref<3x128xbf16, #tpu.memory_space<vmem>>, vector<3x128xbf16>
    %cst_7 = arith.constant dense<0.000000e+00> : vector<8x128xf32>
    %11 = tpu.matmul %9, %10, %cst_7 {dimension_numbers = #tpu.dot_dimension_numbers<[1], [0], [0], [1], [0, 0, 1, 1], [], []>} : vector<8x3xbf16>, vector<3x128xbf16>, vector<8x128xf32> -> vector<8x128xf32>
    %12 = arith.addf %2, %11 : vector<8x128xf32>
    %c0_8 = arith.constant 0 : index
    %c0_9 = arith.constant 0 : index
    %13 = vector.load %arg4[%c0_8, %c0_9] : memref<1x128xf32, #tpu.memory_space<vmem>>, vector<1x128xf32>
    %14 = vector.broadcast %13 : vector<1x128xf32> to vector<8x128xf32>
    %15 = arith.addf %12, %14 : vector<8x128xf32>
    %cst_10 = arith.constant dense<0.000000e+00> : vector<128xf32>
    %16 = vector.multi_reduction <add>, %15, %cst_10 [0] : vector<8x128xf32> to vector<128xf32>
    %17 = vector.shape_cast %16 : vector<128xf32> to vector<1x128xf32>
    %cst_11 = arith.constant 8.000000e+00 : f32
    %18 = vector.broadcast %cst_11 : f32 to vector<1x128xf32>
    %19 = arith.divf %17, %18 : vector<1x128xf32>
    %20 = vector.broadcast %19 : vector<1x128xf32> to vector<8x128xf32>
    %21 = arith.subf %15, %20 : vector<8x128xf32>
    %22 = arith.mulf %21, %21 : vector<8x128xf32>
    %cst_12 = arith.constant dense<0.000000e+00> : vector<128xf32>
    %23 = vector.multi_reduction <add>, %22, %cst_12 [0] : vector<8x128xf32> to vector<128xf32>
    %24 = vector.shape_cast %23 : vector<128xf32> to vector<1x128xf32>
    %cst_13 = arith.constant 8.000000e+00 : f32
    %25 = vector.broadcast %cst_13 : f32 to vector<1x128xf32>
    %26 = arith.divf %24, %25 : vector<1x128xf32>
    %c0_14 = arith.constant 0 : index
    %c0_15 = arith.constant 0 : index
    %27 = vector.load %arg5[%c0_14, %c0_15] : memref<1x128xf32, #tpu.memory_space<vmem>>, vector<1x128xf32>
    %cst_16 = arith.constant 1.000000e-03 : f32
    %28 = vector.broadcast %cst_16 : f32 to vector<1x128xf32>
    %29 = arith.addf %26, %28 : vector<1x128xf32>
    %30 = math.rsqrt %29 : vector<1x128xf32>
    %31 = arith.mulf %27, %30 : vector<1x128xf32>
    %32 = vector.broadcast %31 : vector<1x128xf32> to vector<8x128xf32>
    %33 = arith.mulf %21, %32 : vector<8x128xf32>
    %c0_17 = arith.constant 0 : index
    %c0_18 = arith.constant 0 : index
    %34 = vector.load %arg6[%c0_17, %c0_18] : memref<1x128xf32, #tpu.memory_space<vmem>>, vector<1x128xf32>
    %35 = vector.broadcast %34 : vector<1x128xf32> to vector<8x128xf32>
    %36 = arith.addf %33, %35 : vector<8x128xf32>
    %cst_19 = arith.constant 0.000000e+00 : f32
    %37 = vector.broadcast %cst_19 : f32 to vector<8x128xf32>
    %38 = arith.maximumf %36, %37 : vector<8x128xf32>
    %39 = arith.truncf %38 : vector<8x128xf32> to vector<8x128xbf16>
    %c0_20 = arith.constant 0 : index
    %c0_21 = arith.constant 0 : index
    %40 = vector.load %arg7[%c0_20, %c0_21] : memref<8x128xbf16, #tpu.memory_space<vmem>>, vector<8x128xbf16>
    tpu.vector_store %arg7[%c0_20, %c0_21], %39 {strides = array<i32>} : memref<8x128xbf16, #tpu.memory_space<vmem>>, vector<8x128xbf16>,
    return
  }
}

module attributes {stable_mosaic.version = 11 : i64} {
  func.func @_heads_kernel(%arg0: i32, %arg1: memref<8x128xbf16, #tpu.memory_space<vmem>>, %arg2: memref<1x128x256xbf16, #tpu.memory_space<vmem>>, %arg3: memref<1x256xf32, #tpu.memory_space<vmem>>, %arg4: memref<8x128xf32, #tpu.memory_space<vmem>>, %arg5: memref<8x128xf32, #tpu.memory_space<vmem>>) attributes {dimension_semantics = [#tpu.dimension_semantics<parallel>], iteration_bounds = array<i64: 1>, scalar_prefetch = 0 : i64, scratch_operands = 0 : i64, tpu.core_type = #tpu.core_type<tc>, window_params = [{pipeline_mode = #tpu.pipeline_mode<synchronous>, transform_indices = @transform_0, window_bounds = array<i64: 8, 128>}, {transform_indices = @transform_1, window_bounds = array<i64: 1, 128, 256>}, {transform_indices = @transform_2, window_bounds = array<i64: 1, 256>}, {transform_indices = @transform_3, window_bounds = array<i64: 8, 128>}, {transform_indices = @transform_4, window_bounds = array<i64: 8, 128>}]} {
    %c0 = arith.constant 0 : index
    %c0_0 = arith.constant 0 : index
    %0 = vector.load %arg1[%c0, %c0_0] : memref<8x128xbf16, #tpu.memory_space<vmem>>, vector<8x128xbf16>
    %c0_1 = arith.constant 0 : index
    %c0_2 = arith.constant 0 : index
    %c0_3 = arith.constant 0 : index
    %1 = vector.load %arg2[%c0_1, %c0_2, %c0_3] : memref<1x128x256xbf16, #tpu.memory_space<vmem>>, vector<1x128x128xbf16>
    %2 = vector.shape_cast %1 : vector<1x128x128xbf16> to vector<128x128xbf16>
    %cst = arith.constant dense<0.000000e+00> : vector<8x128xf32>
    %3 = tpu.matmul %0, %2, %cst {dimension_numbers = #tpu.dot_dimension_numbers<[1], [0], [0], [1], [0, 0, 1, 1], [], []>} : vector<8x128xbf16>, vector<128x128xbf16>, vector<8x128xf32> -> vector<8x128xf32>
    %c0_4 = arith.constant 0 : index
    %c0_5 = arith.constant 0 : index
    %4 = vector.load %arg3[%c0_4, %c0_5] : memref<1x256xf32, #tpu.memory_space<vmem>>, vector<1x128xf32>
    %5 = vector.broadcast %4 : vector<1x128xf32> to vector<8x128xf32>
    %6 = arith.addf %3, %5 : vector<8x128xf32>
    %c0_6 = arith.constant 0 : index
    %c0_7 = arith.constant 0 : index
    %7 = vector.load %arg4[%c0_6, %c0_7] : memref<8x128xf32, #tpu.memory_space<vmem>>, vector<8x128xf32>
    tpu.vector_store %arg4[%c0_6, %c0_7], %6 {strides = array<i32>} : memref<8x128xf32, #tpu.memory_space<vmem>>, vector<8x128xf32>,
    %c0_8 = arith.constant 0 : index
    %c0_9 = arith.constant 0 : index
    %c128 = arith.constant 128 : index
    %8 = vector.load %arg2[%c0_8, %c0_9, %c128] : memref<1x128x256xbf16, #tpu.memory_space<vmem>>, vector<1x128x128xbf16>
    %9 = vector.shape_cast %8 : vector<1x128x128xbf16> to vector<128x128xbf16>
    %cst_10 = arith.constant dense<0.000000e+00> : vector<8x128xf32>
    %10 = tpu.matmul %0, %9, %cst_10 {dimension_numbers = #tpu.dot_dimension_numbers<[1], [0], [0], [1], [0, 0, 1, 1], [], []>} : vector<8x128xbf16>, vector<128x128xbf16>, vector<8x128xf32> -> vector<8x128xf32>
    %c0_11 = arith.constant 0 : index
    %c128_12 = arith.constant 128 : index
    %11 = vector.load %arg3[%c0_11, %c128_12] : memref<1x256xf32, #tpu.memory_space<vmem>>, vector<1x128xf32>
    %12 = vector.broadcast %11 : vector<1x128xf32> to vector<8x128xf32>
    %13 = arith.addf %10, %12 : vector<8x128xf32>
    %14 = math.exp %13 : vector<8x128xf32>
    %c0_13 = arith.constant 0 : index
    %c0_14 = arith.constant 0 : index
    %15 = vector.load %arg5[%c0_13, %c0_14] : memref<8x128xf32, #tpu.memory_space<vmem>>, vector<8x128xf32>
    tpu.vector_store %arg5[%c0_13, %c0_14], %14 {strides = array<i32>} : memref<8x128xf32, #tpu.memory_space<vmem>>, vector<8x128xf32>,
    return
  }
  func.func @transform_0(%arg0: i32) -> (i32, i32) {
    %c0_i32 = arith.constant 0 : i32
    %c0_i32_0 = arith.constant 0 : i32
    %c0_i32_1 = arith.constant 0 : i32
    return %c0_i32, %c0_i32_0 : i32, i32
  }
  func.func @transform_1(%arg0: i32) -> (i32, i32, i32) {
    %c0_i32 = arith.constant 0 : i32
    %c0_i32_0 = arith.constant 0 : i32
    %c0_i32_1 = arith.constant 0 : i32
    return %arg0, %c0_i32, %c0_i32_0 : i32, i32, i32
  }
  func.func @transform_2(%arg0: i32) -> (i32, i32) {
    %c0_i32 = arith.constant 0 : i32
    %c0_i32_0 = arith.constant 0 : i32
    return %c0_i32, %arg0 : i32, i32
  }
  func.func @transform_3(%arg0: i32) -> (i32, i32) {
    %c0_i32 = arith.constant 0 : i32
    %c0_i32_0 = arith.constant 0 : i32
    return %c0_i32, %arg0 : i32, i32
  }
  func.func @transform_4(%arg0: i32) -> (i32, i32) {
    %c0_i32 = arith.constant 0 : i32
    %c0_i32_0 = arith.constant 0 : i32
    return %c0_i32, %arg0 : i32, i32
  }
}

</mosaic_0001>

<bundles_post_ra>
// kernel: forward.2
= control target key start
LH: loop header
LB: loop body
LE: loop exit
PB: predicated region body
PF: predicated region fallthrough
CT: control target
= control target key end

     0   :  { %vm45_vm0 = vcmask 1040384   ;;  %v223_v0 = vmov 0   ;;  %v224_v2 = vmov 0.0   ;;  %vm46_vm1 = vcmask 1041408   ;;  %s292_s1 = inlined_call_operand.vmem [shape: s32[8,1], index: 1, kind: input, shape index: {}]   ;;  %s293_s2 = inlined_call_operand.vmem [shape: bf16[16,128], index: 2, kind: input, shape index: {}]   ;;  %s294_s3 = inlined_call_operand.vmem [shape: bf16[3,128], index: 3, kind: input, shape index: {}]   ;;  %s295_s0 = inlined_call_operand.vmem [shape: bf16[8,16], index: 0, kind: input, shape index: {}]   ;;  %s296_s4 = inlined_call_operand.vmem [shape: f32[1,128], index: 4, kind: input, shape index: {}]   ;;  %s297_s5 = inlined_call_operand.vmem [shape: f32[1,128], index: 5, kind: input, shape index: {}]   ;;  %s298_s6 = inlined_call_operand.vmem [shape: f32[1,128], index: 6, kind: input, shape index: {}]   ;;  %s299_s7 = inlined_call_operand.vmem [shape: bf16[8,128], index: 7, kind: output, shape index: {}]  }
   0x1   :  { %219 = vset.pattern.permute.xlu0 %v223_v0  ;;  %v30_v1 = vld [vmem:[%s292_s1] sm:$0xff]  ;;  %209 = vmatprep.subr.bf16.mxu1 %v224_v2  ;;  %vm225_vm2 = vmmov 0   ;;  %v226_v5 = vmov 65535   ;;  %vm98_vm3 = vcmask 130048   ;;  %v31_v10 = vlaneseq }
   0x2   :  { %34 = vperm.xlu0 %219, %v30_v1   ;;  %v220_v3 = vld [vmem:[%s293_s2] sm:$0xff]   ;;  %203 = vmatprep.subr.bf16.mxu0 %v224_v2  ;;  %v47_v6 = vsel %vm45_vm0, 4294967295, %v226_v5  ;;  %vm41_vm5 = vcmask 23552  }
   0x3   :  { %211 = vmatprep.mubr.msk.bf16.mxu1 %vm225_vm2, %v224_v2  ;;  %v40_v4 = vld [vmem:[%s294_s3] sm:$0x3]  ;;  %205 = vmatprep.mubr.msk.bf16.mxu0 %vm225_vm2, %v224_v2  ;;  %v48_v8 = vsel %vm46_vm1, %v47_v6, 0  ;;  %v32_v11 = vand.u32 127, %v31_v10  ;;  %v173_v43 = vshrl.u32 %v31_v10, 7 }
   0x4   :  { %210 = vmatpush3.bf16.msra.mxu1 %v220_v3  ;;  %v27_v7 = vld [vmem:[%s295_s0] sm:$0xf]  ;;  %v50_v9 = vand.u32 %v48_v8, %v40_v4 }
   0x5   :  { %v197_v20 = vld [vmem:[%s296_s4] ss:$0 sm:$0xff]  ;;  %v174_v45 = vsub.s32 0, %v173_v43 }
   0x6   :  { %204 = vmatpush3.bf16.msra.mxu0 %v50_v9  ;;  %v167_v44 = vld [vmem:[%s297_s5] sm:$0x1] }
   0x7   :  { %212 = vmatmul.mubr.msk.bf16.vlgmr.msra.gmra.mrb[0].mxu1 %vm98_vm3, %v27_v7  ;;  %v198_v49 = vld [vmem:[%s298_s6] ss:$0 sm:$0xff] }
  0x81   :  { %v35_v12 = vpop.permute.xlu0 %34 }
  0x82   :  { %vm36_vm4 = vcmp.eq.s32.totalorder %v35_v12, %v32_v11 }
  0x83   :  { %v193_v13 = vsel %vm36_vm4, 1.0, %v224_v2 }
  0x84   :  { %v39_v14 = vpack.c.bf16 %v193_v13, %v193_v13 }
  0x86   :  { %206 = vmatmul.mubr.msk.bf16.vlgmr.msra.gmra.mrb[0].mxu0 %vm41_vm5, %v39_v14 }
  0xda   :  { %v136_v15 = vpop.f32.mrb[0].mxu1 }
  0xdb   :  { %v213_v16 = vpop.f32.mrb[1].mxu1 }
  0xdc   :  { %v139_v17 = vpop.f32.mrb[2].mxu1 }
  0xdd   :  { %v214_v18 = vpop.f32.mrb[3].mxu1 }
 0x159   :  { %v86_v19 = vpop.f32.mrb[0].mxu0 }
 0x15a   :  { %v137_v21 = vadd.f32 %v136_v15, %v86_v19  ;;  %v207_v22 = vpop.f32.mrb[1].mxu0 }
 0x15b   :  { %v89_v23 = vpop.f32.mrb[2].mxu0 }
 0x15c   :  { %v149_v24 = vadd.f32 %v197_v20, %v137_v21  ;;  %v208_v25 = vpop.f32.mrb[3].mxu0 }
 0x15e   :  { %v150_v26 = vrot.slane %v149_v24, 4 }
 0x160   :  { %v151_v27 = vadd.f32 %v150_v26, %v149_v24 }
 0x162   :  { %v152_v28 = vrot.slane %v151_v27, 2 }
 0x164   :  { %v153_v29 = vadd.f32 %v152_v28, %v151_v27 }
 0x166   :  { %v154_v30 = vrot.slane %v153_v29, 1 }
 0x168   :  { %v155_v31 = vadd.f32 %v154_v30, %v153_v29 }
 0x16a   :  { %v157_v32 = vmul.f32 0.125, %v155_v31 }
 0x16c   :  { %v158_v33 = vsub.f32 %v149_v24, %v157_v32 }
 0x16e   :  { %v159_v34 = vmul.f32 %v158_v33, %v158_v33 }
 0x170   :  { %v160_v35 = vrot.slane %v159_v34, 4 }
 0x172   :  { %v161_v36 = vadd.f32 %v160_v35, %v159_v34 }
 0x174   :  { %v162_v37 = vrot.slane %v161_v36, 2 }
 0x176   :  { %v163_v38 = vadd.f32 %v162_v37, %v161_v36 }
 0x178   :  { %v164_v39 = vrot.slane %v163_v38, 1 }
 0x17a   :  { %v165_v40 = vadd.f32 %v164_v39, %v163_v38 }
 0x17c   :  { %v166_v41 = vmul.f32 0.125, %v165_v40 }
 0x17e   :  { %v168_v42 = vadd.f32 0.001, %v166_v41 }
 0x180   :  { %221 = vrsqrt.f32 %v168_v42 }
 0x18a   :  { %v222_v46 = vpop.eup %221 }
 0x18b   :  { %v170_v47 = vmul.f32 %v222_v46, %v167_v44 }
 0x18d   :  { %v175_v48 = vrot.slane %v170_v47, %v174_v45 }
 0x18f   :  { %v177_v50 = vmul.f32 %v175_v48, %v158_v33 }
 0x191   :  { %v185_v51 = vadd.f32 %v198_v49, %v177_v50 }
 0x193   :  { %v186_v52 = vmax.f32 %v185_v51, 0.0 }
 0x195   :  { %v187_v53 = vpack.c.bf16 %v186_v52, %v186_v52 }
 0x197   :  { %188 = vst [vmem:[%s299_s7] sm:$0xf] %v187_v53 }

// kernel: forward.3
= control target key start
LH: loop header
LB: loop body
LE: loop exit
PB: predicated region body
PF: predicated region fallthrough
CT: control target
= control target key end

     0   :  { %10 = vsyncpa [#allocation3], 0  ;;  %v420_v0 = vmov 0.0   ;;  %vm421_vm0 = vmmov 0   ;;  %s530_s0 = inlined_call_operand.vmem [shape: bf16[8,128], index: 0, kind: input, shape index: {}]   ;;  %s531_s1 = inlined_call_operand.vmem [shape: bf16[1,128,256], index: 1, kind: input, shape index: {}]   ;;  %s532_s2 = inlined_call_operand.vmem [shape: f32[1,256], index: 2, kind: input, shape index: {}]   ;;  %s533_s3 = inlined_call_operand.hbm [shape: f32[8,128], index: 3, kind: output, shape index: {0}]   ;;  %s534_s4 = inlined_call_operand.hbm [shape: f32[8,128], index: 4, kind: output, shape index: {1}]  }
   0x1   :  { %330 = vmatprep.subr.bf16.mxu1 %v420_v0  ;;  %v354_v1 = vld [vmem:[%s531_s1 + $0x4] ss:$8 sps:$4 sm:$0xff]   ;;  %310 = vmatprep.subr.bf16.mxu0 %v420_v0  ;;  %v355_v2 = vld [vmem:[%s531_s1 + $0x14] ss:$8 sps:$4 sm:$0xff]   ;;  %v357_v3 = vld [vmem:[%s531_s1] ss:$8 sps:$4 sm:$0xff]  }
   0x2   :  { %346 = vmatprep.mubr.msk.bf16.mxu1 %vm421_vm0, %v420_v0  ;;  %326 = vmatprep.mubr.msk.bf16.mxu0 %vm421_vm0, %v420_v0  ;;  %v359_v4 = vld [vmem:[%s531_s1 + $0x10] ss:$8 sps:$4 sm:$0xff]   ;;  %v356_v5 = vld [vmem:[%s531_s1 + $0x24] ss:$8 sps:$4 sm:$0xff]   ;;  %v361_v6 = vld [vmem:[%s531_s1 + $0x20] ss:$8 sps:$4 sm:$0xff]  }
   0x3   :  { %331 = vmatpush3.bf16.msra.mxu1 %v354_v1  ;;  %311 = vmatpush3.bf16.msra.mxu0 %v357_v3  ;;  %v358_v7 = vld [vmem:[%s531_s1 + $0x34] ss:$8 sps:$4 sm:$0xff]   ;;  %v363_v8 = vld [vmem:[%s531_s1 + $0x30] ss:$8 sps:$4 sm:$0xff]   ;;  %v360_v9 = vld [vmem:[%s531_s1 + $0x44] ss:$8 sps:$4 sm:$0xff]  }
   0x4   :  { %332 = vmatprep.subr.bf16.mxu1 %v420_v0  ;;  %312 = vmatprep.subr.bf16.mxu0 %v420_v0 }
   0x7   :  { %333 = vmatpush3.bf16.msra.mxu1 %v355_v2  ;;  %313 = vmatpush3.bf16.msra.mxu0 %v359_v4 }
   0x8   :  { %334 = vmatprep.subr.bf16.mxu1 %v420_v0  ;;  %314 = vmatprep.subr.bf16.mxu0 %v420_v0 }
   0xb   :  { %335 = vmatpush3.bf16.msra.mxu1 %v356_v5  ;;  %315 = vmatpush3.bf16.msra.mxu0 %v361_v6 }
   0xc   :  { %336 = vmatprep.subr.bf16.mxu1 %v420_v0  ;;  %316 = vmatprep.subr.bf16.mxu0 %v420_v0 }
   0xf   :  { %337 = vmatpush3.bf16.msra.mxu1 %v358_v7 }
  0x10   :  { %338 = vmatprep.subr.bf16.mxu1 %v420_v0 }
  0x11   :  { %11 = vsyncpa [#allocation5], 0  ;;  %317 = vmatpush3.bf16.msra.mxu0 %v363_v8  ;;  %v365_v10 = vld [vmem:[%s531_s1 + $0x40] ss:$8 sps:$4 sm:$0xff]   ;;  %v362_v11 = vld [vmem:[%s531_s1 + $0x54] ss:$8 sps:$4 sm:$0xff]  }
  0x12   :  { %318 = vmatprep.subr.bf16.mxu0 %v420_v0  ;;  %v367_v12 = vld [vmem:[%s531_s1 + $0x50] ss:$8 sps:$4 sm:$0xff]   ;;  %v364_v13 = vld [vmem:[%s531_s1 + $0x64] ss:$8 sps:$4 sm:$0xff]   ;;  %v368_v14 = vld [vmem:[%s531_s1 + $0x60] ss:$8 sps:$4 sm:$0xff]  }
  0x13   :  { %339 = vmatpush3.bf16.msra.mxu1 %v360_v9  ;;  %v366_v15 = vld [vmem:[%s531_s1 + $0x74] ss:$8 sps:$4 sm:$0xff]   ;;  %v369_v16 = vld [vmem:[%s531_s1 + $0x70] ss:$8 sps:$4 sm:$0xff]   ;;  %v19_v17 = vld [vmem:[%s530_s0] sm:$0xf] }
  0x14   :  { %340 = vmatprep.subr.bf16.mxu1 %v420_v0  ;;  %v283_v18 = vld [vmem:[%s532_s2 + $0x1] ss:$0 sm:$0xff]  ;;  %v274_v22 = vld [vmem:[%s532_s2] ss:$0 sm:$0xff]  ;;  %s422_s1 = smov [#allocation2]  }
  0x15   :  { %319 = vmatpush3.bf16.msra.mxu0 %v365_v10  ;;  %s252_s27 = sshll.u32 %s422_s1, 4  ;;  %s253_s27 = int_to_ptr.vmem [resolvable:$true] %s252_s27 }
  0x16   :  { %320 = vmatprep.subr.bf16.mxu0 %v420_v0  ;;  %s372_s0 = scalar_lea.vmem %s253_s27, 128  ;;  %p377_p1 = scmp.lt.s32.totalorder %s253_s27, %s253_s27 }
  0x17   :  { %341 = vmatpush3.bf16.msra.mxu1 %v362_v11  ;;  %p373_p0 = scmp.ne.s32.totalorder %s253_s27, %s372_s0  ;;  %p378_p2 = scmp.lt.s32.totalorder %s372_s0, %s372_s0 }
  0x18   :  { %342 = vmatprep.subr.bf16.mxu1 %v420_v0 }
  0x19   :  { %321 = vmatpush3.bf16.msra.mxu0 %v367_v12  ;;  %p379_p3 = por %p378_p2, %p377_p1 }
  0x1a   :  { %322 = vmatprep.subr.bf16.mxu0 %v420_v0 }
  0x1b   :  { %343 = vmatpush3.bf16.msra.mxu1 %v364_v13  ;;  %p380_p4 = pnand %p379_p3, %p373_p0 }
  0x1c   :  { %344 = vmatprep.subr.bf16.mxu1 %v420_v0 }
  0x1d   :  { %323 = vmatpush3.bf16.msra.mxu0 %v368_v14 }
  0x1e   :  { %324 = vmatprep.subr.bf16.mxu0 %v420_v0 }
  0x1f   :  { %345 = vmatpush3.bf16.msra.mxu1 %v366_v15 }
  0x21   :  { %325 = vmatpush3.bf16.msra.mxu0 %v369_v16 }
  0x22   :  { %347 = vmatmul.mubr.bf16.vlgmr.msra.gmra.mrb[0].mxu1 %v19_v17 }
  0x24   :  { %327 = vmatmul.mubr.bf16.vlgmr.msra.gmra.mrb[0].mxu0 %v19_v17 }
  0xf5   :  { %v237_v19 = vpop.f32.mrb[0].mxu1 }
  0xf6   :  { %v238_v20 = vadd.f32 %v283_v18, %v237_v19  ;;  %v348_v21 = vpop.f32.mrb[1].mxu1 }
  0xf7   :  { %v240_v23 = vpop.f32.mrb[2].mxu1  ;;  %v125_v26 = vpop.f32.mrb[0].mxu0 }
  0xf8   :  { %v243_v24 = vmul.f32 1.442695, %v238_v20  ;;  %v349_v25 = vpop.f32.mrb[3].mxu1  ;;  %v126_v27 = vadd.f32 %v274_v22, %v125_v26  ;;  %v328_v28 = vpop.f32.mrb[1].mxu0 }
  0xf9   :  { %v128_v29 = vpop.f32.mrb[2].mxu0 }
  0xfa   :  { %370 = vpow2.f32 %v243_v24  ;;  %131 = vst [vmem:[#allocation2] sm:$0xff] %v126_v27  ;;  %v329_v30 = vpop.f32.mrb[3].mxu0 }
  0xfb   :  { %383 = shalt.err (!%p380_p4)
}
  0xfc   :  { %s384_s29 = scalar_lea.hbm %s533_s3, 128 }
  0xfd   :  { %p385_p5 = scmp.ne.s32.totalorder %s533_s3, %s384_s29  ;;  %p388_p6 = scmp.lt.u32.totalorder %s384_s29, %s533_s3 }
  0xff   :  { %p390_p7 = pnand %p388_p6, %p385_p5 }
 0x101   :  { %393 = shalt.err (!%p390_p7)
}
 0x102   :  { %255 = dma.vmem_to_hbm [thread:$0]  %s253_s27, 128, %s533_s3, [#allocation3]  }
 0x103   :  { %s423_s10 = smov [#allocation4]  }
 0x104   :  { %s262_s11 = sshll.u32 %s423_s10, 4  ;;  %v371_v31 = vpop.eup %370  ;;  %s263_s11 = int_to_ptr.vmem [resolvable:$true] %s262_s11 }
 0x105   :  { %245 = vst [vmem:[#allocation4] sm:$0xff] %v371_v31  ;;  %s394_s12 = scalar_lea.vmem %s263_s11, 128  ;;  %p399_p9 = scmp.lt.s32.totalorder %s263_s11, %s263_s11 }
 0x106   :  { %p395_p8 = scmp.ne.s32.totalorder %s263_s11, %s394_s12  ;;  %p400_p10 = scmp.lt.s32.totalorder %s394_s12, %s394_s12 }
 0x108   :  { %p401_p11 = por %p400_p10, %p399_p9 }
 0x10a   :  { %p402_p12 = pnand %p401_p11, %p395_p8 }
 0x10c   :  { %405 = shalt.err (!%p402_p12)
}
 0x10d   :  { %s406_s15 = scalar_lea.hbm %s534_s4, 128 }
 0x10e   :  { %p407_p13 = scmp.ne.s32.totalorder %s534_s4, %s406_s15  ;;  %p410_p0 = scmp.lt.u32.totalorder %s406_s15, %s534_s4 }
 0x110   :  { %p412_p1 = pnand %p410_p0, %p407_p13 }
 0x112   :  { %415 = shalt.err (!%p412_p1)
}
 0x113   :  { %265 = dma.vmem_to_hbm [thread:$0]  %s263_s11, 128, %s534_s4, [#allocation5]  }
 0x114   :  { %416 = dma.done.wait [#allocation3], 128  }
 0x115   :  { %417 = vsyncadd [#allocation3], 4294967168 }
 0x116   :  { %418 = dma.done.wait [#allocation5], 128  }
 0x117   :  { %419 = vsyncadd [#allocation5], 4294967168 }
 0x118   :  { %272 = vsyncpa [#allocation3], 1 }
 0x119   :  { %273 = vsyncpa [#allocation5], 1 }

</bundles_post_ra>
